<compile_context>
chip_gen: v5e
topology: v5e:2x2
jax: 0.10.0
libtpu: 0.0.40
codegen_flags: <defaults>
</compile_context>

<pallas_src>
import jax
import jax.numpy as jnp
from jax.experimental import pallas as pl
from jax.experimental.pallas import tpu as pltpu

BN_EPS = 1e-5
LANE = 128


def _round_up(n, m):
    return ((n + m - 1) // m) * m


def _full_spec(arr):
    # Whole-array resident block.  `nd` is bound per call (no late-binding
    # capture) and `*_` keeps the map valid under any future grid arity:
    # a resident operand always maps to block (0, ..., 0).
    nd = arr.ndim
    return pl.BlockSpec(arr.shape, lambda *_: (0,) * nd)


def _batchnorm_train(h, gamma, beta):
    # nn.BatchNorm1d training semantics: batch mean + *biased* variance over
    # axis 0.  All f32 elementwise (correct split for v5e: bf16 only at MXU).
    mu = jnp.mean(h, axis=0, keepdims=True)
    diff = h - mu
    var = jnp.mean(diff * diff, axis=0, keepdims=True)
    return diff * jax.lax.rsqrt(var + BN_EPS) * gamma + beta


def mlp_kernel(x_ref, w1_ref, w2_ref, w3_ref, vec_ref, o_ref):
    """Fused 3-layer MLP, fully resident in VMEM, single grid point."""
    hid = w1_ref.shape[1]
    out_pad = o_ref.shape[1]

    # Packed per-feature vectors (row layout from prepare_params):
    #   0: gamma1   1: beta1   2: gamma2   3: beta2   4: b3 (lane-padded)
    g1 = vec_ref[0:1, :hid]
    be1 = vec_ref[1:2, :hid]
    g2 = vec_ref[2:3, :hid]
    be2 = vec_ref[3:4, :hid]
    b3 = vec_ref[4:5, :out_pad]

    x = x_ref[...]  # bf16, lane-padded K

    # Layer 1: Linear + BN + ReLU.  bf16 operands straight into the MXU with
    # f32 accumulation.  Linear bias dropped: BN mean-subtraction cancels it.
    h = jnp.dot(x, w1_ref[...], preferred_element_type=jnp.float32)
    h = jnp.maximum(_batchnorm_train(h, g1, be1), 0.0)

    # Layer 2: same pattern; activation recast to bf16 only at the MXU edge.
    h = jnp.dot(h.astype(jnp.bfloat16), w2_ref[...],
                preferred_element_type=jnp.float32)
    h = jnp.maximum(_batchnorm_train(h, g2, be2), 0.0)

    # Layer 3: Linear with lane-padded output columns -> lane-dense store.
    out = jnp.dot(h.astype(jnp.bfloat16), w3_ref[...],
                  preferred_element_type=jnp.float32) + b3
    o_ref[...] = out.astype(o_ref.dtype)


def init_params(key, input_dim, hidden_dim, output_dim):
    """PyTorch-equivalent f32 parameters (nn.Linear / nn.BatchNorm1d init)."""
    ks = jax.random.split(key, 6)

    def linear(kw, kb, fan_in, fan_out):
        bound = 1.0 / jnp.sqrt(fan_in)
        w = jax.random.uniform(kw, (fan_in, fan_out), jnp.float32, -bound, bound)
        b = jax.random.uniform(kb, (fan_out,), jnp.float32, -bound, bound)
        return w, b.reshape(1, fan_out)

    w1, b1 = linear(ks[0], ks[1], input_dim, hidden_dim)
    w2, b2 = linear(ks[2], ks[3], hidden_dim, hidden_dim)
    w3, b3 = linear(ks[4], ks[5], hidden_dim, output_dim)

    ones_h = jnp.ones((1, hidden_dim), jnp.float32)
    zeros_h = jnp.zeros((1, hidden_dim), jnp.float32)

    return dict(
        w1=w1, b1=b1, g1=ones_h, be1=zeros_h,
        w2=w2, b2=b2, g2=ones_h, be2=zeros_h,
        w3=w3, b3=b3,
    )


def prepare_params(p):
    """One-time kernel prep: bf16 weights, lane padding, packed vectors."""
    in_dim, hid = p["w1"].shape
    out_dim = p["w3"].shape[1]
    assert hid % LANE == 0, "hidden_dim must be a multiple of 128"

    in_pad = _round_up(in_dim, LANE)
    out_pad = _round_up(out_dim, LANE)

    # Lane-pad the K dimension of layer 1 and the N dimension of layer 3.
    w1 = jnp.zeros((in_pad, hid), jnp.float32).at[:in_dim, :].set(p["w1"])
    w3 = jnp.zeros((hid, out_pad), jnp.float32).at[:, :out_dim].set(p["w3"])

    # Pack all per-feature vectors into one (8, vec_w) operand.
    # b1/b2 intentionally dropped: training-mode BN cancels them exactly.
    vec_w = max(hid, out_pad)
    vec = jnp.zeros((8, vec_w), jnp.float32)
    vec = vec.at[0, :hid].set(p["g1"].reshape(-1))
    vec = vec.at[1, :hid].set(p["be1"].reshape(-1))
    vec = vec.at[2, :hid].set(p["g2"].reshape(-1))
    vec = vec.at[3, :hid].set(p["be2"].reshape(-1))
    vec = vec.at[4, :out_dim].set(p["b3"].reshape(-1))

    return dict(
        w1=w1.astype(jnp.bfloat16),
        w2=p["w2"].astype(jnp.bfloat16),
        w3=w3.astype(jnp.bfloat16),
        vec=vec,
        in_dim=in_dim, in_pad=in_pad,
        out_dim=out_dim, out_pad=out_pad,
    )


def fully_connected_forward(x, kp):
    """x: [B, input_dim] f32.  kp: output of prepare_params."""
    B = x.shape[0]
    in_dim, in_pad = kp["in_dim"], kp["in_pad"]
    out_dim, out_pad = kp["out_dim"], kp["out_pad"]

    # Lane-pad + bf16-cast the activations (single tiny fused XLA op).
    x_in = jnp.pad(x, ((0, 0), (0, in_pad - in_dim))).astype(jnp.bfloat16)

    operands = (x_in, kp["w1"], kp["w2"], kp["w3"], kp["vec"])

    out_padded = pl.pallas_call(
        mlp_kernel,
        out_shape=jax.ShapeDtypeStruct((B, out_pad), jnp.float32),
        in_specs=[_full_spec(op) for op in operands],
        out_specs=pl.BlockSpec((B, out_pad), lambda *_: (0, 0)),
        compiler_params=pltpu.CompilerParams(
            # Fully-resident design (~0.3 MiB here).  Guard against the v7x
            # budget (32 MiB scoped default / 64 MiB physical per TC) so a
            # larger hidden_dim fails loudly instead of spilling silently.
            vmem_limit_bytes=32 * 1024 * 1024,
        ),
    )(*operands)

    # Drop the lane padding of the final layer.
    return out_padded[:, :out_dim]


def reference_forward(x, p):
    """Pure-JAX reference mirroring the kernel's precision choices.

    Matmuls use bf16 operands with f32 accumulation (same as the kernel's
    MXU path).  Linear biases b1/b2 are *kept* here, which also validates
    that dropping them in the kernel is a no-op under training-mode BN.
    """
    def bn(h, g, b):
        mu = jnp.mean(h, axis=0, keepdims=True)
        var = jnp.mean((h - mu) ** 2, axis=0, keepdims=True)
        return (h - mu) * jax.lax.rsqrt(var + BN_EPS) * g + b

    def mm(a, w):
        return jnp.dot(a.astype(jnp.bfloat16), w.astype(jnp.bfloat16),
                       preferred_element_type=jnp.float32)

    h = jnp.maximum(bn(mm(x, p["w1"]) + p["b1"], p["g1"], p["be1"]), 0.0)
    h = jnp.maximum(bn(mm(h, p["w2"]) + p["b2"], p["g2"], p["be2"]), 0.0)
    return mm(h, p["w3"]) + p["b3"]


if __name__ == "__main__":
    # Small shapes consistent with the module: x is [batch, input_dim].
    batch, input_dim, hidden_dim, output_dim = 8, 32, 256, 16

    key = jax.random.PRNGKey(0)
    kx, kp_key = jax.random.split(key)
    x = jax.random.normal(kx, (batch, input_dim), dtype=jnp.float32)

    params = init_params(kp_key, input_dim, hidden_dim, output_dim)
    kparams = prepare_params(params)

    out = fully_connected_forward(x, kparams)
    out = jax.block_until_ready(out)

    ref = reference_forward(x, params)
    assert out.shape == (batch, output_dim)
    assert jnp.allclose(out, ref, atol=2e-3, rtol=2e-3), "mismatch vs reference"

    print("KERNEL_OK")
</pallas_src>

<mosaic_0001>
module attributes {stable_mosaic.version = 11 : i64} {
  func.func @mlp_kernel(%arg0: memref<8x128xbf16, #tpu.memory_space<vmem>>, %arg1: memref<128x256xbf16, #tpu.memory_space<vmem>>, %arg2: memref<256x256xbf16, #tpu.memory_space<vmem>>, %arg3: memref<256x128xbf16, #tpu.memory_space<vmem>>, %arg4: memref<8x256xf32, #tpu.memory_space<vmem>>, %arg5: memref<8x128xf32, #tpu.memory_space<vmem>>) attributes {dimension_semantics = [], scalar_prefetch = 0 : i64, scratch_operands = 0 : i64, tpu.core_type = #tpu.core_type<tc>} {
    %c0 = arith.constant 0 : index
    %c0_0 = arith.constant 0 : index
    %0 = vector.load %arg4[%c0, %c0_0] : memref<8x256xf32, #tpu.memory_space<vmem>>, vector<1x256xf32>
    %c1 = arith.constant 1 : index
    %c0_1 = arith.constant 0 : index
    %1 = vector.load %arg4[%c1, %c0_1] : memref<8x256xf32, #tpu.memory_space<vmem>>, vector<1x256xf32>
    %c2 = arith.constant 2 : index
    %c0_2 = arith.constant 0 : index
    %2 = vector.load %arg4[%c2, %c0_2] : memref<8x256xf32, #tpu.memory_space<vmem>>, vector<1x256xf32>
    %c3 = arith.constant 3 : index
    %c0_3 = arith.constant 0 : index
    %3 = vector.load %arg4[%c3, %c0_3] : memref<8x256xf32, #tpu.memory_space<vmem>>, vector<1x256xf32>
    %c4 = arith.constant 4 : index
    %c0_4 = arith.constant 0 : index
    %4 = vector.load %arg4[%c4, %c0_4] : memref<8x256xf32, #tpu.memory_space<vmem>>, vector<1x128xf32>
    %c0_5 = arith.constant 0 : index
    %c0_6 = arith.constant 0 : index
    %5 = vector.load %arg0[%c0_5, %c0_6] : memref<8x128xbf16, #tpu.memory_space<vmem>>, vector<8x128xbf16>
    %c0_7 = arith.constant 0 : index
    %c0_8 = arith.constant 0 : index
    %6 = vector.load %arg1[%c0_7, %c0_8] : memref<128x256xbf16, #tpu.memory_space<vmem>>, vector<128x256xbf16>
    %cst = arith.constant dense<0.000000e+00> : vector<8x256xf32>
    %7 = tpu.matmul %5, %6, %cst {dimension_numbers = #tpu.dot_dimension_numbers<[1], [0], [0], [1], [0, 0, 1, 1], [], []>} : vector<8x128xbf16>, vector<128x256xbf16>, vector<8x256xf32> -> vector<8x256xf32>
    %cst_9 = arith.constant dense<0.000000e+00> : vector<256xf32>
    %8 = vector.multi_reduction <add>, %7, %cst_9 [0] : vector<8x256xf32> to vector<256xf32>
    %9 = vector.shape_cast %8 : vector<256xf32> to vector<1x256xf32>
    %cst_10 = arith.constant 8.000000e+00 : f32
    %10 = vector.broadcast %cst_10 : f32 to vector<1x256xf32>
    %11 = arith.divf %9, %10 : vector<1x256xf32>
    %12 = vector.broadcast %11 : vector<1x256xf32> to vector<8x256xf32>
    %13 = arith.subf %7, %12 : vector<8x256xf32>
    %14 = arith.mulf %13, %13 : vector<8x256xf32>
    %cst_11 = arith.constant dense<0.000000e+00> : vector<256xf32>
    %15 = vector.multi_reduction <add>, %14, %cst_11 [0] : vector<8x256xf32> to vector<256xf32>
    %16 = vector.shape_cast %15 : vector<256xf32> to vector<1x256xf32>
    %cst_12 = arith.constant 8.000000e+00 : f32
    %17 = vector.broadcast %cst_12 : f32 to vector<1x256xf32>
    %18 = arith.divf %16, %17 : vector<1x256xf32>
    %cst_13 = arith.constant 9.99999974E-6 : f32
    %19 = vector.broadcast %cst_13 : f32 to vector<1x256xf32>
    %20 = arith.addf %18, %19 : vector<1x256xf32>
    %21 = math.rsqrt %20 : vector<1x256xf32>
    %22 = vector.broadcast %21 : vector<1x256xf32> to vector<8x256xf32>
    %23 = arith.mulf %13, %22 : vector<8x256xf32>
    %24 = vector.broadcast %0 : vector<1x256xf32> to vector<8x256xf32>
    %25 = arith.mulf %23, %24 : vector<8x256xf32>
    %26 = vector.broadcast %1 : vector<1x256xf32> to vector<8x256xf32>
    %27 = arith.addf %25, %26 : vector<8x256xf32>
    %cst_14 = arith.constant 0.000000e+00 : f32
    %28 = vector.broadcast %cst_14 : f32 to vector<8x256xf32>
    %29 = arith.maximumf %27, %28 : vector<8x256xf32>
    %30 = arith.truncf %29 : vector<8x256xf32> to vector<8x256xbf16>
    %c0_15 = arith.constant 0 : index
    %c0_16 = arith.constant 0 : index
    %31 = vector.load %arg2[%c0_15, %c0_16] : memref<256x256xbf16, #tpu.memory_space<vmem>>, vector<256x256xbf16>
    %cst_17 = arith.constant dense<0.000000e+00> : vector<8x256xf32>
    %32 = tpu.matmul %30, %31, %cst_17 {dimension_numbers = #tpu.dot_dimension_numbers<[1], [0], [0], [1], [0, 0, 1, 1], [], []>} : vector<8x256xbf16>, vector<256x256xbf16>, vector<8x256xf32> -> vector<8x256xf32>
    %cst_18 = arith.constant dense<0.000000e+00> : vector<256xf32>
    %33 = vector.multi_reduction <add>, %32, %cst_18 [0] : vector<8x256xf32> to vector<256xf32>
    %34 = vector.shape_cast %33 : vector<256xf32> to vector<1x256xf32>
    %cst_19 = arith.constant 8.000000e+00 : f32
    %35 = vector.broadcast %cst_19 : f32 to vector<1x256xf32>
    %36 = arith.divf %34, %35 : vector<1x256xf32>
    %37 = vector.broadcast %36 : vector<1x256xf32> to vector<8x256xf32>
    %38 = arith.subf %32, %37 : vector<8x256xf32>
    %39 = arith.mulf %38, %38 : vector<8x256xf32>
    %cst_20 = arith.constant dense<0.000000e+00> : vector<256xf32>
    %40 = vector.multi_reduction <add>, %39, %cst_20 [0] : vector<8x256xf32> to vector<256xf32>
    %41 = vector.shape_cast %40 : vector<256xf32> to vector<1x256xf32>
    %cst_21 = arith.constant 8.000000e+00 : f32
    %42 = vector.broadcast %cst_21 : f32 to vector<1x256xf32>
    %43 = arith.divf %41, %42 : vector<1x256xf32>
    %cst_22 = arith.constant 9.99999974E-6 : f32
    %44 = vector.broadcast %cst_22 : f32 to vector<1x256xf32>
    %45 = arith.addf %43, %44 : vector<1x256xf32>
    %46 = math.rsqrt %45 : vector<1x256xf32>
    %47 = vector.broadcast %46 : vector<1x256xf32> to vector<8x256xf32>
    %48 = arith.mulf %38, %47 : vector<8x256xf32>
    %49 = vector.broadcast %2 : vector<1x256xf32> to vector<8x256xf32>
    %50 = arith.mulf %48, %49 : vector<8x256xf32>
    %51 = vector.broadcast %3 : vector<1x256xf32> to vector<8x256xf32>
    %52 = arith.addf %50, %51 : vector<8x256xf32>
    %cst_23 = arith.constant 0.000000e+00 : f32
    %53 = vector.broadcast %cst_23 : f32 to vector<8x256xf32>
    %54 = arith.maximumf %52, %53 : vector<8x256xf32>
    %55 = arith.truncf %54 : vector<8x256xf32> to vector<8x256xbf16>
    %c0_24 = arith.constant 0 : index
    %c0_25 = arith.constant 0 : index
    %56 = vector.load %arg3[%c0_24, %c0_25] : memref<256x128xbf16, #tpu.memory_space<vmem>>, vector<256x128xbf16>
    %cst_26 = arith.constant dense<0.000000e+00> : vector<8x128xf32>
    %57 = tpu.matmul %55, %56, %cst_26 {dimension_numbers = #tpu.dot_dimension_numbers<[1], [0], [0], [1], [0, 0, 1, 1], [], []>} : vector<8x256xbf16>, vector<256x128xbf16>, vector<8x128xf32> -> vector<8x128xf32>
    %58 = vector.broadcast %4 : vector<1x128xf32> to vector<8x128xf32>
    %59 = arith.addf %57, %58 : vector<8x128xf32>
    %c0_27 = arith.constant 0 : index
    %c0_28 = arith.constant 0 : index
    %60 = vector.load %arg5[%c0_27, %c0_28] : memref<8x128xf32, #tpu.memory_space<vmem>>, vector<8x128xf32>
    tpu.vector_store %arg5[%c0_27, %c0_28], %59 {strides = array<i32>} : memref<8x128xf32, #tpu.memory_space<vmem>>, vector<8x128xf32>,
    return
  }
}

</mosaic_0001>

<bundles_post_ra>
// kernel: tpu_custom_call.1
= control target key start
LH: loop header
LB: loop body
LE: loop exit
PB: predicated region body
PF: predicated region fallthrough
CT: control target
= control target key end

     0   :  { %10 = vsyncpa [#allocation3], 0  ;;  %s1390_s0 = inlined_call_operand.hbm [shape: bf16[8,128], index: 0, kind: input, shape index: {}]   ;;  %s1391_s1 = inlined_call_operand.hbm [shape: bf16[128,256], index: 1, kind: input, shape index: {}]   ;;  %s1392_s2 = inlined_call_operand.hbm [shape: bf16[256,256], index: 2, kind: input, shape index: {}]   ;;  %s1393_s3 = inlined_call_operand.hbm [shape: bf16[256,128], index: 3, kind: input, shape index: {}]   ;;  %s1394_s4 = inlined_call_operand.hbm [shape: f32[8,256], index: 4, kind: input, shape index: {}]   ;;  %s1395_s5 = inlined_call_operand.hbm [shape: f32[8,128], index: 5, kind: output, shape index: {}]  }
   0x1   :  { %11 = vsyncpa [#allocation6], 0 }
   0x2   :  { %12 = vsyncpa [#allocation9], 0  ;;  %s29_s20 = sshll.u32 %s1391_s1, 4  ;;  %s30_s20 = int_to_ptr.hbm [resolvable:$true] %s29_s20 }
   0x3   :  { %13 = vsyncpa [#allocation4], 0  ;;  %s1292_s21 = smov [#allocation5]   ;;  %s55_s25 = sshll.u32 %s1393_s3, 4  ;;  %s56_s25 = int_to_ptr.hbm [resolvable:$true] %s55_s25 }
   0x4   :  { %s31_s22 = sshll.u32 %s1292_s21, 4  ;;  %s1293_s26 = smov 128   ;;  %s32_s22 = int_to_ptr.vmem [resolvable:$true] %s31_s22 }
   0x5   :  { %s1294_s27 = smov 8   ;;  %s1295_s28 = smov [#allocation8]  }
   0x6   :  { %37 = dma.hbm_to_vmem [thread:$0]  %s30_s20, 2048, %s32_s22, [#allocation6], %s1293_s26, %s1293_s26, %s1294_s27  }
   0x7   :  { %s57_s29 = sshll.u32 %s1295_s28, 4  ;;  %s1296_s30 = smov 64   ;;  %s58_s29 = int_to_ptr.vmem [resolvable:$true] %s57_s29 }
   0x8   :  { %s1297_s6 = smov 4   ;;  %s19_s8 = sshll.u32 %s1390_s0, 4  ;;  %s20_s8 = int_to_ptr.hbm [resolvable:$true] %s19_s8 }
   0x9   :  { %63 = dma.hbm_to_vmem [thread:$0]  %s56_s25, 2048, %s58_s29, [#allocation9], %s1296_s30, %s1296_s30, %s1297_s6  }
   0xa   :  { %s1298_s9 = smov [#allocation2]   ;;  %s42_s12 = sshll.u32 %s1392_s2, 4  ;;  %s43_s12 = int_to_ptr.hbm [resolvable:$true] %s42_s12 }
   0xb   :  { %s21_s10 = sshll.u32 %s1298_s9, 4  ;;  %s1299_s13 = smov [#allocation7]   ;;  %s22_s10 = int_to_ptr.vmem [resolvable:$true] %s21_s10 }
   0xc   :  { %24 = dma.hbm_to_vmem [thread:$0]  %s20_s8, 64, %s22_s10, [#allocation3]  }
   0xd   :  { %s44_s14 = sshll.u32 %s1299_s13, 4  ;;  %s69_s17 = sshll.u32 %s1394_s4, 4  ;;  %s45_s14 = int_to_ptr.vmem [resolvable:$true] %s44_s14  ;;  %s70_s17 = int_to_ptr.hbm [resolvable:$true] %s69_s17 }
   0xe   :  { %50 = dma.hbm_to_vmem [thread:$0]  %s43_s12, 4096, %s45_s14, [#allocation6], %s1293_s26, %s1293_s26, %s1294_s27  }
   0xf   :  { %s1300_s0 = smov [#allocation10]  }
  0x10   :  { %s71_s18 = sshll.u32 %s1300_s0, 4  ;;  %s72_s18 = int_to_ptr.vmem [resolvable:$true] %s71_s18 }
  0x11   :  { %74 = dma.hbm_to_vmem [thread:$0]  %s70_s17, 256, %s72_s18, [#allocation9]  }
  0x12   :  { %1284 = dma.done.wait [#allocation3], 64  }
  0x13   :  { %1285 = vsyncadd [#allocation3], 4294967232 }
  0x14   :  { %1286 = dma.done.wait [#allocation6], 6144  }
  0x15   :  { %1287 = vsyncadd [#allocation6], 4294961152 }
  0x16   :  { %1288 = dma.done.wait [#allocation9], 2304  }
  0x17   :  { %1289 = vsyncadd [#allocation9], 4294964992  ;;  %v857_v0 = vld [vmem:[#allocation5 + $0x70] sm:$0xf]  ;;  %v1070_v1 = vld [vmem:[#allocation5 + $0x74] sm:$0xf0] }
  0x18   :  { %v1069_v2 = vld [vmem:[#allocation5 + $0x74] sm:$0xf]  ;;  %v858_v3 = vor.u32 %v1070_v1, %v857_v0  ;;  %v859_v4 = vld [vmem:[#allocation5 + $0x78] sm:$0xf0]  ;;  %v849_v5 = vld [vmem:[#allocation5 + $0x60] sm:$0xf] }
  0x19   :  { %v1068_v6 = vld [vmem:[#allocation5 + $0x64] sm:$0xf0]  ;;  %v862_v7 = vor.u32 %v1069_v2, %v859_v4  ;;  %v1067_v8 = vld [vmem:[#allocation5 + $0x64] sm:$0xf]  ;;  %v851_v9 = vld [vmem:[#allocation5 + $0x68] sm:$0xf0] }
  0x1a   :  { %200 = vmatpush.bf16.msra.mxu0 %v858_v3  ;;  %v850_v10 = vor.u32 %v1068_v6, %v849_v5  ;;  %v854_v11 = vor.u32 %v1067_v8, %v851_v9  ;;  %v841_v12 = vld [vmem:[#allocation5 + $0x50] sm:$0xf]  ;;  %v1066_v13 = vld [vmem:[#allocation5 + $0x54] sm:$0xf0]  ;;  %v1065_v14 = vld [vmem:[#allocation5 + $0x54] sm:$0xf] }
  0x1b   :  { %213 = vmatpush.bf16.msra.mxu1 %v862_v7  ;;  %v843_v15 = vld [vmem:[#allocation5 + $0x58] sm:$0xf0]  ;;  %v842_v16 = vor.u32 %v1066_v13, %v841_v12  ;;  %v833_v18 = vld [vmem:[#allocation5 + $0x40] sm:$0xf]  ;;  %v1064_v19 = vld [vmem:[#allocation5 + $0x44] sm:$0xf0] }
  0x1c   :  { %v846_v17 = vor.u32 %v1065_v14, %v843_v15  ;;  %v1063_v20 = vld [vmem:[#allocation5 + $0x44] sm:$0xf]  ;;  %v835_v21 = vld [vmem:[#allocation5 + $0x48] sm:$0xf0]  ;;  %v834_v22 = vor.u32 %v1064_v19, %v833_v18  ;;  %v825_v24 = vld [vmem:[#allocation5 + $0x30] sm:$0xf] }
  0x1d   :  { %v838_v23 = vor.u32 %v1063_v20, %v835_v21  ;;  %v1062_v25 = vld [vmem:[#allocation5 + $0x34] sm:$0xf0]  ;;  %v1061_v26 = vld [vmem:[#allocation5 + $0x34] sm:$0xf]  ;;  %v827_v27 = vld [vmem:[#allocation5 + $0x38] sm:$0xf0] }
  0x1e   :  { %201 = vmatpush.bf16.msra.mxu0 %v850_v10  ;;  %v826_v28 = vor.u32 %v1062_v25, %v825_v24  ;;  %v830_v29 = vor.u32 %v1061_v26, %v827_v27  ;;  %v817_v30 = vld [vmem:[#allocation5 + $0x20] sm:$0xf]  ;;  %v1060_v31 = vld [vmem:[#allocation5 + $0x24] sm:$0xf0]  ;;  %v1059_v32 = vld [vmem:[#allocation5 + $0x24] sm:$0xf] }
  0x1f   :  { %214 = vmatpush.bf16.msra.mxu1 %v854_v11  ;;  %v819_v33 = vld [vmem:[#allocation5 + $0x28] sm:$0xf0]  ;;  %v818_v34 = vor.u32 %v1060_v31, %v817_v30  ;;  %v809_v36 = vld [vmem:[#allocation5 + $0x10] sm:$0xf]  ;;  %v1058_v37 = vld [vmem:[#allocation5 + $0x14] sm:$0xf0] }
  0x20   :  { %v822_v35 = vor.u32 %v1059_v32, %v819_v33  ;;  %v1057_v38 = vld [vmem:[#allocation5 + $0x14] sm:$0xf]  ;;  %v811_v39 = vld [vmem:[#allocation5 + $0x18] sm:$0xf0]  ;;  %v810_v40 = vor.u32 %v1058_v37, %v809_v36  ;;  %v801_v42 = vld [vmem:[#allocation5] sm:$0xf] }
  0x21   :  { %v814_v41 = vor.u32 %v1057_v38, %v811_v39  ;;  %v1056_v43 = vld [vmem:[#allocation5 + $0x4] sm:$0xf0]  ;;  %v1055_v44 = vld [vmem:[#allocation5 + $0x4] sm:$0xf]  ;;  %v803_v45 = vld [vmem:[#allocation5 + $0x8] sm:$0xf0] }
  0x22   :  { %202 = vmatpush.bf16.msra.mxu0 %v842_v16  ;;  %v802_v46 = vor.u32 %v1056_v43, %v801_v42  ;;  %v806_v47 = vor.u32 %v1055_v44, %v803_v45  ;;  %v103_v48 = vld [vmem:[#allocation2] sm:$0xf]  ;;  %v1301_v49 = vmov 8.0   ;;  %v921_v53 = vld [vmem:[#allocation7 + $0x70] sm:$0xf]  ;;  %s1302_s2 = smov [#allocation11]  }
  0x23   :  { %215 = vmatpush.bf16.msra.mxu1 %v846_v17  ;;  %1130 = vrcp.f32 %v1301_v49  ;;  %v1086_v54 = vld [vmem:[#allocation7 + $0x74] sm:$0xf0]  ;;  %v985_v55 = vld [vmem:[#allocation7 + $0xf0] sm:$0xf]  ;;  %v1085_v58 = vld [vmem:[#allocation7 + $0x74] sm:$0xf] }
  0x24   :  { %v922_v56 = vor.u32 %v1086_v54, %v921_v53  ;;  %v1102_v57 = vld [vmem:[#allocation7 + $0xf4] sm:$0xf0]  ;;  %v923_v59 = vld [vmem:[#allocation7 + $0x78] sm:$0xf0]  ;;  %v1101_v63 = vld [vmem:[#allocation7 + $0xf4] sm:$0xf] }
  0x25   :  { %v986_v61 = vor.u32 %v1102_v57, %v985_v55  ;;  %v926_v62 = vor.u32 %v1085_v58, %v923_v59  ;;  %v987_v0 = vld [vmem:[#allocation7 + $0xf8] sm:$0xf0]  ;;  %v913_v6 = vld [vmem:[#allocation7 + $0x60] sm:$0xf]  ;;  %v1084_v7 = vld [vmem:[#allocation7 + $0x64] sm:$0xf0] }
  0x26   :  { %203 = vmatpush.bf16.msra.mxu0 %v834_v22  ;;  %499 = vmatpush.bf16.msra.mxu2 %v922_v56  ;;  %v990_v3 = vor.u32 %v1101_v63, %v987_v0  ;;  %v914_v9 = vor.u32 %v1084_v7, %v913_v6  ;;  %v977_v10 = vld [vmem:[#allocation7 + $0xe0] sm:$0xf]  ;;  %v1100_v11 = vld [vmem:[#allocation7 + $0xe4] sm:$0xf0]  ;;  %v1083_v12 = vld [vmem:[#allocation7 + $0x64] sm:$0xf] }
  0x27   :  { %216 = vmatpush.bf16.msra.mxu1 %v838_v23  ;;  %512 = vmatpush.bf16.msra.mxu3 %v986_v61  ;;  %v978_v14 = vor.u32 %v1100_v11, %v977_v10  ;;  %v915_v15 = vld [vmem:[#allocation7 + $0x68] sm:$0xf0]  ;;  %v1099_v16 = vld [vmem:[#allocation7 + $0xe4] sm:$0xf]  ;;  %v905_v23 = vld [vmem:[#allocation7 + $0x50] sm:$0xf] }
  0x28   :  { %v979_v17 = vld [vmem:[#allocation7 + $0xe8] sm:$0xf0]  ;;  %v918_v19 = vor.u32 %v1083_v12, %v915_v15  ;;  %v1082_v24 = vld [vmem:[#allocation7 + $0x54] sm:$0xf0]  ;;  %v969_v27 = vld [vmem:[#allocation7 + $0xd0] sm:$0xf] }
  0x29   :  { %v1348_v50 = vpop.eup %1130  ;;  %v982_v20 = vor.u32 %v1099_v16, %v979_v17  ;;  %v906_v26 = vor.u32 %v1082_v24, %v905_v23  ;;  %v907_v33 = vld [vmem:[#allocation7 + $0x58] sm:$0xf0]  ;;  %v897_v42 = vld [vmem:[#allocation7 + $0x40] sm:$0xf]  ;;  %v1080_v43 = vld [vmem:[#allocation7 + $0x44] sm:$0xf0] }
  0x2a   :  { %204 = vmatpush.bf16.msra.mxu0 %v826_v28  ;;  %v239_v51 = vmul.f32 8.0, %v1348_v50  ;;  %500 = vmatpush.bf16.msra.mxu2 %v914_v9  ;;  %vm243_vm0 = vweird.f32 %v1348_v50  ;;  %v1098_v28 = vld [vmem:[#allocation7 + $0xd4] sm:$0xf0]  ;;  %v898_v45 = vor.u32 %v1080_v43, %v897_v42  ;;  %v1095_v53 = vld [vmem:[#allocation7 + $0xc4] sm:$0xf]  ;;  %s785_s4 = sshll.u32 %s1302_s2, 4  ;;  %s786_s4 = int_to_ptr.vmem [resolvable:$true] %s785_s4 }
  0x2b   :  { %217 = vmatpush.bf16.msra.mxu1 %v830_v29  ;;  %513 = vmatpush.bf16.msra.mxu3 %v978_v14  ;;  %v1081_v29 = vld [vmem:[#allocation7 + $0x54] sm:$0xf]  ;;  %v970_v32 = vor.u32 %v1098_v28, %v969_v27  ;;  %v963_v54 = vld [vmem:[#allocation7 + $0xc8] sm:$0xf0]  ;;  %v889_v58 = vld [vmem:[#allocation7 + $0x30] sm:$0xf] }
  0x2c   :  { %v240_v52 = vsub.f32 1.0, %v239_v51  ;;  %v910_v38 = vor.u32 %v1081_v29, %v907_v33  ;;  %v966_v56 = vor.u32 %v1095_v53, %v963_v54  ;;  %v1078_v59 = vld [vmem:[#allocation7 + $0x34] sm:$0xf0]  ;;  %v953_v61 = vld [vmem:[#allocation7 + $0xb0] sm:$0xf]  ;;  %s787_s21 = sshll.u32 %s1395_s5, 4  ;;  %s788_s21 = int_to_ptr.hbm [resolvable:$true] %s787_s21 }
  0x2d   :  { %v890_v63 = vor.u32 %v1078_v59, %v889_v58  ;;  %v1094_v0 = vld [vmem:[#allocation7 + $0xb4] sm:$0xf0]  ;;  %v1093_v7 = vld [vmem:[#allocation7 + $0xb4] sm:$0xf]  ;;  %v881_v11 = vld [vmem:[#allocation7 + $0x20] sm:$0xf] }
  0x2e   :  { %205 = vmatpush.bf16.msra.mxu0 %v818_v34  ;;  %v241_v4 = vmul.f32 %v1348_v50, %v240_v52  ;;  %v1097_v34 = vld [vmem:[#allocation7 + $0xd4] sm:$0xf]  ;;  %501 = vmatpush.bf16.msra.mxu2 %v906_v26  ;;  %v899_v52 = vld [vmem:[#allocation7 + $0x48] sm:$0xf0]  ;;  %v1076_v12 = vld [vmem:[#allocation7 + $0x24] sm:$0xf0] }
  0x2f   :  { %218 = vmatpush.bf16.msra.mxu1 %v822_v35  ;;  %v971_v35 = vld [vmem:[#allocation7 + $0xd8] sm:$0xf0]  ;;  %514 = vmatpush.bf16.msra.mxu3 %v970_v32  ;;  %v1092_v15 = vld [vmem:[#allocation7 + $0xa4] sm:$0xf0]  ;;  %v1075_v16 = vld [vmem:[#allocation7 + $0x24] sm:$0xf] }
  0x30   :  { %v242_v21 = vadd.f32 %v1348_v50, %v241_v4  ;;  %v974_v39 = vor.u32 %v1097_v34, %v971_v35  ;;  %v947_v23 = vld [vmem:[#allocation7 + $0xa8] sm:$0xf0]  ;;  %v873_v26 = vld [vmem:[#allocation7 + $0x10] sm:$0xf]  ;;  %v1074_v27 = vld [vmem:[#allocation7 + $0x14] sm:$0xf0] }
  0x31   :  { %v937_v28 = vld [vmem:[#allocation7 + $0x90] sm:$0xf]  ;;  %v1073_v32 = vld [vmem:[#allocation7 + $0x14] sm:$0xf]  ;;  %v875_v35 = vld [vmem:[#allocation7 + $0x18] sm:$0xf0] }
  0x32   :  { %206 = vmatpush.bf16.msra.mxu0 %v810_v40  ;;  %v1365_v40 = vsel %vm243_vm0, %v1348_v50, %v242_v21  ;;  %502 = vmatpush.bf16.msra.mxu2 %v898_v45  ;;  %v1072_v42 = vld [vmem:[#allocation7 + $0x4] sm:$0xf0]  ;;  %v1087_v53 = vld [vmem:[#allocation7 + $0x84] sm:$0xf] }
  0x33   :  { %219 = vmatpush.bf16.msra.mxu1 %v814_v41 }
  0x36   :  { %207 = vmatpush.bf16.msra.mxu0 %v802_v46  ;;  %v961_v46 = vld [vmem:[#allocation7 + $0xc0] sm:$0xf]  ;;  %503 = vmatpush.bf16.msra.mxu2 %v890_v63 }
  0x37   :  { %220 = vmatpush.bf16.msra.mxu1 %v806_v47  ;;  %v1096_v47 = vld [vmem:[#allocation7 + $0xc4] sm:$0xf0] }
  0x38   :  { %v962_v51 = vor.u32 %v1096_v47, %v961_v46  ;;  %v929_v46 = vld [vmem:[#allocation7 + $0x80] sm:$0xf]  ;;  %v1088_v47 = vld [vmem:[#allocation7 + $0x84] sm:$0xf0] }
  0x39   :  { %208 = vmatmul.bf16.vlgmr.msra.gmra.mxu0 %v103_v48 }
  0x3a   :  { %221 = vmatmul.bf16.vlgmr.msra.gmra.mxu1 %v103_v48  ;;  %525 = vmatpush.bf16.msrb.mxu0 %v926_v62  ;;  %v1079_v48 = vld [vmem:[#allocation7 + $0x44] sm:$0xf] }
  0x3b   :  { %538 = vmatpush.bf16.msrb.mxu1 %v990_v3  ;;  %v902_v50 = vor.u32 %v1079_v48, %v899_v52  ;;  %515 = vmatpush.bf16.msra.mxu3 %v962_v51  ;;  %v891_v3 = vld [vmem:[#allocation7 + $0x38] sm:$0xf0]  ;;  %v1071_v48 = vld [vmem:[#allocation7 + $0x4] sm:$0xf]  ;;  %v930_v51 = vor.u32 %v1088_v47, %v929_v46  ;;  %v867_v52 = vld [vmem:[#allocation7 + $0x8] sm:$0xf0] }
  0x3c   :  { %v1109_v47 = vld [vmem:[#allocation8 + $0x30] sm:$0xff] }
  0x3e   :  { %526 = vmatpush.bf16.msrb.mxu0 %v918_v19  ;;  %v883_v19 = vld [vmem:[#allocation7 + $0x28] sm:$0xf0] }
  0x3f   :  { %539 = vmatpush.bf16.msrb.mxu1 %v982_v20  ;;  %v1091_v20 = vld [vmem:[#allocation7 + $0xa4] sm:$0xf] }
  0x42   :  { %527 = vmatpush.bf16.msrb.mxu0 %v910_v38  ;;  %v878_v38 = vor.u32 %v1073_v32, %v875_v35 }
  0x43   :  { %540 = vmatpush.bf16.msrb.mxu1 %v974_v39  ;;  %v939_v39 = vld [vmem:[#allocation7 + $0x98] sm:$0xf0] }
  0x46   :  { %528 = vmatpush.bf16.msrb.mxu0 %v902_v50  ;;  %v931_v50 = vld [vmem:[#allocation7 + $0x88] sm:$0xf0] }
  0x47   :  { %541 = vmatpush.bf16.msrb.mxu1 %v966_v56 }
  0xb6   :  { %v1351_v60 = vpop.f32.mrf.mxu0 }
  0xb7   :  { %v226_v1 = vrot.slane %v1351_v60, 4  ;;  %v1354_v2 = vpop.f32.mrf.mxu1 }
  0xb8   :  { %v232_v5 = vrot.slane %v1354_v2, 4 }
  0xb9   :  { %v227_v8 = vadd.f32 %v226_v1, %v1351_v60  ;;  %v1077_v1 = vld [vmem:[#allocation7 + $0x34] sm:$0xf] }
  0xba   :  { %v233_v13 = vadd.f32 %v232_v5, %v1354_v2  ;;  %v954_v5 = vor.u32 %v1094_v0, %v953_v61  ;;  %v894_v6 = vor.u32 %v1077_v1, %v891_v3 }
  0xbb   :  { %v228_v18 = vrot.slane %v227_v8, 2 }
  0xbc   :  { %v234_v22 = vrot.slane %v233_v13, 2  ;;  %516 = vmatpush.bf16.msra.mxu3 %v954_v5  ;;  %529 = vmatpush.bf16.msrb.mxu0 %v894_v6 }
  0xbd   :  { %v229_v25 = vadd.f32 %v228_v18, %v227_v8  ;;  %v955_v8 = vld [vmem:[#allocation7 + $0xb8] sm:$0xf0] }
  0xbe   :  { %v235_v30 = vadd.f32 %v234_v22, %v233_v13  ;;  %v211_v31 = vpop.f32.mrf.mxu0  ;;  %v958_v10 = vor.u32 %v1093_v7, %v955_v8  ;;  %v945_v13 = vld [vmem:[#allocation7 + $0xa0] sm:$0xf]  ;;  %v886_v22 = vor.u32 %v1075_v16, %v883_v19 }
  0xbf   :  { %v230_v36 = vrot.slane %v229_v25, 1  ;;  %v224_v37 = vpop.f32.mrf.mxu1  ;;  %v946_v18 = vor.u32 %v1092_v15, %v945_v13  ;;  %v1090_v31 = vld [vmem:[#allocation7 + $0x94] sm:$0xf0] }
  0xc0   :  { %v236_v41 = vrot.slane %v235_v30, 1  ;;  %542 = vmatpush.bf16.msrb.mxu1 %v958_v10  ;;  %530 = vmatpush.bf16.msrb.mxu0 %v886_v22  ;;  %v938_v34 = vor.u32 %v1090_v31, %v937_v28 }
  0xc1   :  { %v231_v44 = vadd.f32 %v230_v36, %v229_v25  ;;  %517 = vmatpush.bf16.msra.mxu3 %v946_v18  ;;  %v950_v25 = vor.u32 %v1091_v20, %v947_v23  ;;  %v1089_v36 = vld [vmem:[#allocation7 + $0x94] sm:$0xf] }
  0xc2   :  { %v237_v49 = vadd.f32 %v236_v41, %v235_v30  ;;  %v874_v30 = vor.u32 %v1074_v27, %v873_v26  ;;  %v865_v41 = vld [vmem:[#allocation7] sm:$0xf] }
  0xc3   :  { %v245_v55 = vmul.f32 %v1365_v40, %v231_v44  ;;  %v942_v44 = vor.u32 %v1089_v36, %v939_v39  ;;  %v866_v45 = vor.u32 %v1072_v42, %v865_v41 }
  0xc4   :  { %v246_v57 = vmul.f32 %v1365_v40, %v237_v49  ;;  %543 = vmatpush.bf16.msrb.mxu1 %v950_v25  ;;  %531 = vmatpush.bf16.msrb.mxu0 %v878_v38  ;;  %v1110_v38 = vld [vmem:[#allocation8 + $0x38] sm:$0xff] }
  0xc5   :  { %v1370_v62 = vsub.f32 %v1351_v60, %v245_v55  ;;  %518 = vmatpush.bf16.msra.mxu3 %v938_v34  ;;  %v870_v55 = vor.u32 %v1071_v48, %v867_v52 }
  0xc6   :  { %v1373_v4 = vsub.f32 %v1354_v2, %v246_v57  ;;  %v882_v2 = vor.u32 %v1076_v12, %v881_v11  ;;  %v934_v57 = vor.u32 %v1087_v53, %v931_v50  ;;  %v95_v11 = vld [vmem:[#allocation10] ss:$8 sm:$0x3] }
  0xc7   :  { %v249_v9 = vmul.f32 %v1370_v62, %v1370_v62  ;;  %v290_v15 = vperm.slane %v95_v11, 0  ;;  %v1108_v50 = vld [vmem:[#allocation8 + $0x28] sm:$0xff] }
  0xc8   :  { %v250_v60 = vmul.f32 %v1373_v4, %v1373_v4  ;;  %504 = vmatpush.bf16.msra.mxu2 %v882_v2  ;;  %544 = vmatpush.bf16.msrb.mxu1 %v942_v44  ;;  %v1116_v44 = vld [vmem:[#allocation8 + $0x68] sm:$0xff] }
  0xc9   :  { %v251_v14 = vrot.slane %v249_v9, 4  ;;  %519 = vmatpush.bf16.msra.mxu3 %v930_v51  ;;  %532 = vmatpush.bf16.msrb.mxu0 %v870_v55  ;;  %v1115_v51 = vld [vmem:[#allocation8 + $0x60] sm:$0xff] }
  0xca   :  { %v257_v17 = vrot.slane %v250_v60, 4 }
  0xcb   :  { %v252_v21 = vadd.f32 %v251_v14, %v249_v9  ;;  %v97_v14 = vld [vmem:[#allocation10 + $0x1] ss:$8 sm:$0x3] }
  0xcc   :  { %v258_v24 = vadd.f32 %v257_v17, %v250_v60  ;;  %505 = vmatpush.bf16.msra.mxu2 %v874_v30  ;;  %545 = vmatpush.bf16.msrb.mxu1 %v934_v57  ;;  %v291_v17 = vperm.slane %v95_v11, 1  ;;  %v297_v20 = vperm.slane %v97_v14, 0  ;;  %v298_v22 = vperm.slane %v97_v14, 1 }
  0xcd   :  { %v253_v29 = vrot.slane %v252_v21, 2 }
  0xce   :  { %v259_v33 = vrot.slane %v258_v24, 2 }
  0xcf   :  { %v254_v37 = vadd.f32 %v253_v29, %v252_v21 }
  0xd0   :  { %v260_v43 = vadd.f32 %v259_v33, %v258_v24  ;;  %506 = vmatpush.bf16.msra.mxu2 %v866_v45 }
  0xd1   :  { %v255_v49 = vrot.slane %v254_v37, 1 }
  0xd2   :  { %v261_v54 = vrot.slane %v260_v43, 1 }
  0xd3   :  { %v256_v56 = vadd.f32 %v255_v49, %v254_v37 }
  0xd4   :  { %v262_v58 = vadd.f32 %v261_v54, %v260_v43  ;;  %753 = vmatpush.bf16.msrb.mxu2 %v1110_v38 }
  0xd5   :  { %v263_v59 = vmul.f32 %v256_v56, %v1365_v40 }
  0xd6   :  { %v264_v61 = vmul.f32 %v262_v58, %v1365_v40  ;;  %v1114_v58 = vld [vmem:[#allocation8 + $0x58] sm:$0xff] }
  0xd7   :  { %v265_v63 = vadd.f32 1e-05, %v263_v59 }
  0xd8   :  { %v266_v0 = vadd.f32 1e-05, %v264_v61  ;;  %754 = vmatpush.bf16.msrb.mxu2 %v1109_v47 }
  0xd9   :  { %1132 = vrsqrt.f32 %v265_v63  ;;  %vm273_vm3 = vweird.f32 %v265_v63 }
  0xda   :  { %1134 = vrsqrt.f32 %v266_v0  ;;  %vm283_vm5 = vweird.f32 %v266_v0 }
  0xdc   :  { %755 = vmatpush.bf16.msrb.mxu2 %v1108_v50 }
  0xdf   :  { %v1133_v1 = vpop.eup %1132 }
  0xe0   :  { %v1135_v3 = vpop.eup %1134  ;;  %v268_v5 = vmul.f32 %v1133_v1, %v265_v63  ;;  %vm274_vm1 = vweird.f32 %v1133_v1  ;;  %v1107_v63 = vld [vmem:[#allocation8 + $0x20] sm:$0xff] }
  0xe1   :  { %v278_v6 = vmul.f32 %v1135_v3, %v266_v0  ;;  %vm284_vm2 = vweird.f32 %v1135_v3  ;;  %vm275_vm4 = vmor %vm273_vm3, %vm274_vm1  ;;  %756 = vmatpush.bf16.msrb.mxu2 %v1107_v63 }
  0xe2   :  { %v269_v7 = vmul.f32 %v1133_v1, %v268_v5  ;;  %vm285_vm6 = vmor %vm283_vm5, %vm284_vm2 }
  0xe3   :  { %v279_v8 = vmul.f32 %v1135_v3, %v278_v6 }
  0xe4   :  { %v270_v9 = vmul.f32 0.5, %v269_v7  ;;  %v1106_v7 = vld [vmem:[#allocation8 + $0x18] sm:$0xff] }
  0xe5   :  { %v280_v10 = vmul.f32 0.5, %v279_v8  ;;  %757 = vmatpush.bf16.msrb.mxu2 %v1106_v7 }
  0xe6   :  { %v271_v60 = vsub.f32 1.5, %v270_v9 }
  0xe7   :  { %v281_v12 = vsub.f32 1.5, %v280_v10  ;;  %v1112_v10 = vld [vmem:[#allocation8 + $0x48] sm:$0xff] }
  0xe8   :  { %v272_v13 = vmul.f32 %v1133_v1, %v271_v60 }
  0xe9   :  { %v282_v2 = vmul.f32 %v1135_v3, %v281_v12  ;;  %v1105_v12 = vld [vmem:[#allocation8 + $0x10] sm:$0xff] }
  0xea   :  { %v276_v16 = vsel %vm275_vm4, %v1133_v1, %v272_v13  ;;  %758 = vmatpush.bf16.msrb.mxu2 %v1105_v12 }
  0xeb   :  { %v287_v18 = vmul.f32 %v276_v16, %v1370_v62  ;;  %v286_v19 = vsel %vm285_vm6, %v1135_v3, %v282_v2  ;;  %v1118_v62 = vld [vmem:[#allocation8 + $0x78] sm:$0xff]  ;;  %v1113_v3 = vld [vmem:[#allocation8 + $0x50] sm:$0xff]  ;;  %v1111_v2 = vld [vmem:[#allocation8 + $0x40] sm:$0xff] }
  0xec   :  { %v288_v21 = vmul.f32 %v286_v19, %v1373_v4  ;;  %766 = vmatpush.bf16.msrb.mxu3 %v1118_v62  ;;  %v1117_v4 = vld [vmem:[#allocation8 + $0x70] sm:$0xff] }
  0xed   :  { %v294_v23 = vmul.f32 %v290_v15, %v287_v18 }
  0xee   :  { %v295_v24 = vmul.f32 %v291_v17, %v288_v21  ;;  %v1104_v17 = vld [vmem:[#allocation8 + $0x8] sm:$0xff] }
  0xef   :  { %v301_v25 = vadd.f32 %v297_v20, %v294_v23  ;;  %759 = vmatpush.bf16.msrb.mxu2 %v1104_v17 }
  0xf0   :  { %v302_v26 = vadd.f32 %v298_v22, %v295_v24  ;;  %767 = vmatpush.bf16.msrb.mxu3 %v1117_v4  ;;  %v1103_v22 = vld [vmem:[#allocation8] sm:$0xff] }
  0xf1   :  { %v303_v27 = vmax.f32 %v301_v25, 0.0 }
  0xf2   :  { %v304_v28 = vmax.f32 %v302_v26, 0.0 }
  0xf3   :  { %v305_v29 = vpack.c.bf16 %v303_v27, %v303_v27  ;;  %760 = vmatpush.bf16.msrb.mxu2 %v1103_v22 }
  0xf4   :  { %v306_v30 = vpack.c.bf16 %v304_v28, %v304_v28  ;;  %768 = vmatpush.bf16.msrb.mxu3 %v1116_v44 }
  0xf5   :  { %507 = vmatmul.bf16.vlgmr.msra.gmra.mxu2 %v305_v29  ;;  %533 = vmatmul.bf16.vlgmr.msrb.gmra.mxu0 %v305_v29 }
  0xf6   :  { %520 = vmatmul.bf16.vlgmr.msra.gmra.mxu3 %v306_v30  ;;  %546 = vmatmul.bf16.vlgmr.msrb.gmra.mxu1 %v306_v30 }
  0xf8   :  { %769 = vmatpush.bf16.msrb.mxu3 %v1115_v51 }
  0xfc   :  { %770 = vmatpush.bf16.msrb.mxu3 %v1114_v58 }
 0x100   :  { %771 = vmatpush.bf16.msrb.mxu3 %v1113_v3 }
 0x104   :  { %772 = vmatpush.bf16.msrb.mxu3 %v1112_v10 }
 0x108   :  { %773 = vmatpush.bf16.msrb.mxu3 %v1111_v2 }
 0x172   :  { %v534_v31 = vpop.f32.mrf.mxu0 }
 0x173   :  { %v547_v32 = vpop.f32.mrf.mxu1 }
 0x174   :  { %v548_v33 = vadd.f32 %v547_v32, %v534_v31 }
 0x176   :  { %v557_v34 = vrot.slane %v548_v33, 4 }
 0x178   :  { %v558_v35 = vadd.f32 %v557_v34, %v548_v33  ;;  %v508_v36 = vpop.f32.mrf.mxu2  ;;  %v99_v34 = vld [vmem:[#allocation10 + $0x2] ss:$8 sm:$0x3] }
 0x179   :  { %v521_v37 = vpop.f32.mrf.mxu3 }
 0x17a   :  { %v559_v39 = vrot.slane %v558_v35, 2  ;;  %v522_v41 = vadd.f32 %v521_v37, %v508_v36  ;;  %v536_v42 = vpop.f32.mrf.mxu0  ;;  %v101_v36 = vld [vmem:[#allocation10 + $0x3] ss:$8 sm:$0x3]  ;;  %v609_v37 = vperm.slane %v99_v34, 1 }
 0x17b   :  { %v549_v43 = vpop.f32.mrf.mxu1  ;;  %v615_v51 = vperm.slane %v101_v36, 0 }
 0x17c   :  { %v560_v45 = vadd.f32 %v559_v39, %v558_v35  ;;  %v551_v46 = vrot.slane %v522_v41, 4 }
 0x17e   :  { %v561_v48 = vrot.slane %v560_v45, 1  ;;  %v552_v49 = vadd.f32 %v551_v46, %v522_v41  ;;  %v608_v46 = vperm.slane %v99_v34, 0 }
 0x180   :  { %v562_v52 = vadd.f32 %v561_v48, %v560_v45  ;;  %v553_v53 = vrot.slane %v552_v49, 2  ;;  %v510_v54 = vpop.f32.mrf.mxu2 }
 0x181   :  { %v523_v55 = vpop.f32.mrf.mxu3 }
 0x182   :  { %v564_v56 = vmul.f32 %v562_v52, %v1365_v40  ;;  %v554_v57 = vadd.f32 %v553_v53, %v552_v49 }
 0x184   :  { %v566_v59 = vsub.f32 %v548_v33, %v564_v56  ;;  %v555_v61 = vrot.slane %v554_v57, 1 }
 0x186   :  { %v568_v0 = vmul.f32 %v566_v59, %v566_v59  ;;  %v556_v1 = vadd.f32 %v555_v61, %v554_v57  ;;  %v102_v57 = vld [vmem:[#allocation10 + $0x4] ss:$0 sm:$0xff] }
 0x188   :  { %v575_v5 = vrot.slane %v568_v0, 4  ;;  %v563_v6 = vmul.f32 %v556_v1, %v1365_v40 }
 0x18a   :  { %v576_v8 = vadd.f32 %v575_v5, %v568_v0  ;;  %v565_v9 = vsub.f32 %v522_v41, %v563_v6  ;;  %v616_v41 = vperm.slane %v101_v36, 1 }
 0x18c   :  { %v577_v60 = vrot.slane %v576_v8, 2  ;;  %v567_v11 = vmul.f32 %v565_v9, %v565_v9 }
 0x18e   :  { %v578_v13 = vadd.f32 %v577_v60, %v576_v8  ;;  %v569_v14 = vrot.slane %v567_v11, 4 }
 0x190   :  { %v579_v15 = vrot.slane %v578_v13, 1  ;;  %v570_v16 = vadd.f32 %v569_v14, %v567_v11 }
 0x192   :  { %v580_v18 = vadd.f32 %v579_v15, %v578_v13  ;;  %v571_v19 = vrot.slane %v570_v16, 2 }
 0x194   :  { %v582_v20 = vmul.f32 %v580_v18, %v1365_v40  ;;  %v572_v21 = vadd.f32 %v571_v19, %v570_v16 }
 0x196   :  { %v584_v23 = vadd.f32 1e-05, %v582_v20  ;;  %v573_v24 = vrot.slane %v572_v21, 1 }
 0x198   :  { %1136 = vrsqrt.f32 %v584_v23  ;;  %v574_v25 = vadd.f32 %v573_v24, %v572_v21  ;;  %vm601_vm8 = vweird.f32 %v584_v23 }
 0x19a   :  { %v581_v26 = vmul.f32 %v574_v25, %v1365_v40 }
 0x19c   :  { %v583_v27 = vadd.f32 1e-05, %v581_v26 }
 0x19e   :  { %v1137_v28 = vpop.eup %1136  ;;  %1138 = vrsqrt.f32 %v583_v27  ;;  %vm591_vm11 = vweird.f32 %v583_v27 }
 0x19f   :  { %v596_v29 = vmul.f32 %v1137_v28, %v584_v23  ;;  %vm602_vm7 = vweird.f32 %v1137_v28 }
 0x1a0   :  { %vm603_vm9 = vmor %vm601_vm8, %vm602_vm7 }
 0x1a1   :  { %v597_v30 = vmul.f32 %v1137_v28, %v596_v29 }
 0x1a3   :  { %v598_v31 = vmul.f32 0.5, %v597_v30 }
 0x1a4   :  { %v1139_v32 = vpop.eup %1138 }
 0x1a5   :  { %v599_v62 = vsub.f32 1.5, %v598_v31  ;;  %v586_v33 = vmul.f32 %v1139_v32, %v583_v27  ;;  %vm592_vm10 = vweird.f32 %v1139_v32 }
 0x1a6   :  { %vm593_vm12 = vmor %vm591_vm11, %vm592_vm10 }
 0x1a7   :  { %v600_v4 = vmul.f32 %v1137_v28, %v599_v62  ;;  %v587_v35 = vmul.f32 %v1139_v32, %v586_v33 }
 0x1a9   :  { %v604_v38 = vsel %vm603_vm9, %v1137_v28, %v600_v4  ;;  %v588_v39 = vmul.f32 0.5, %v587_v35 }
 0x1aa   :  { %v606_v40 = vmul.f32 %v604_v38, %v566_v59 }
 0x1ab   :  { %v589_v42 = vsub.f32 1.5, %v588_v39 }
 0x1ac   :  { %v613_v43 = vmul.f32 %v609_v37, %v606_v40 }
 0x1ad   :  { %v590_v44 = vmul.f32 %v1139_v32, %v589_v42 }
 0x1ae   :  { %v620_v45 = vadd.f32 %v616_v41, %v613_v43 }
 0x1af   :  { %v594_v47 = vsel %vm593_vm12, %v1139_v32, %v590_v44 }
 0x1b0   :  { %v605_v48 = vmul.f32 %v594_v47, %v565_v9  ;;  %v622_v49 = vmax.f32 %v620_v45, 0.0 }
 0x1b2   :  { %v624_v52 = vpack.c.bf16 %v622_v49, %v622_v49  ;;  %v612_v53 = vmul.f32 %v608_v46, %v605_v48 }
 0x1b4   :  { %774 = vmatmul.bf16.vlgmr.msrb.gmra.mxu3 %v624_v52  ;;  %v619_v54 = vadd.f32 %v615_v51, %v612_v53 }
 0x1b6   :  { %v621_v55 = vmax.f32 %v619_v54, 0.0 }
 0x1b8   :  { %v623_v50 = vpack.c.bf16 %v621_v55, %v621_v55 }
 0x1ba   :  { %761 = vmatmul.bf16.vlgmr.msrb.gmra.mxu2 %v623_v50 }
 0x237   :  { %v775_v56 = vpop.f32.mrf.mxu3 }
 0x23d   :  { %v762_v58 = vpop.f32.mrf.mxu2 }
 0x23e   :  { %v763_v59 = vadd.f32 %v762_v58, %v102_v57 }
 0x23f   :  { %v777_v61 = vpop.f32.mrf.mxu3 }
 0x240   :  { %v776_v63 = vadd.f32 %v775_v56, %v763_v59 }
 0x242   :  { %779 = vst [vmem:[#allocation11] sm:$0xff] %v776_v63 }
 0x243   :  { %790 = dma.vmem_to_hbm [thread:$0]  %s786_s4, 128, %s788_s21, [#allocation4]  }
 0x245   :  { %v764_v0 = vpop.f32.mrf.mxu2 }
 0x246   :  { %1290 = dma.done.wait [#allocation4], 128  }
 0x247   :  { %1291 = vsyncadd [#allocation4], 4294967168 }
 0x248   :  { %795 = vsyncpa [#allocation3], 1 }
 0x249   :  { %796 = vsyncpa [#allocation6], 1 }
 0x24a   :  { %797 = vsyncpa [#allocation9], 1 }
 0x24b   :  { %798 = vsyncpa [#allocation4], 1 }

</bundles_post_ra>
